<compile_context>
chip_gen: v7x
topology: tpu7x:2x2x1
jax: 0.10.0
libtpu: 0.0.40
codegen_flags: <defaults>
</compile_context>

<pallas_src>
import jax
import jax.numpy as jnp
from jax.experimental import pallas as pl
from jax.experimental.pallas import tpu as pltpu


def _round_up(x, m):
    return (x + m - 1) // m * m


def _vmem_capacity_bytes():
    """Per-core VMEM capacity (generation-aware), with a conservative fallback."""
    try:
        return int(pltpu.get_tpu_info().vmem_capacity_bytes)
    except Exception:
        return 128 << 20  # v5e/v6e default


def _epilogue_dtype_for_device():
    """bf16 bias+ReLU epilogue on v6e/v7x (bf16 VPU); f32 elsewhere (v5e-safe)."""
    try:
        kind = jax.devices()[0].device_kind.lower()
    except Exception:
        return jnp.float32
    if "v6" in kind or "v7" in kind or "7x" in kind:
        return jnp.bfloat16
    return jnp.float32


def _resident_spec(shape):
    """VMEM-resident operand: constant index_map; single-buffered (never re-fetched)."""
    index_map = lambda i, _shape=shape: (0,) * len(_shape)
    try:
        return pl.BlockSpec(shape, index_map, pipeline_mode=pl.Buffered(1)), True
    except TypeError:  # older BlockSpec signature: fall back to default double-buffering
        return pl.BlockSpec(shape, index_map), False


def _make_fcnn_kernel(n_sub, sub_rows, compute_dtype, epilogue_dtype):
    bf16_epilogue = jnp.dtype(epilogue_dtype) == jnp.dtype(jnp.bfloat16)

    def bias_relu(h_f32, b):
        if bf16_epilogue:
            # v6e/v7x: cast once, then add+ReLU run 2 elems/lane on the VPU; the result
            # is already in the matmul dtype, so no separate cast pass remains.
            return jnp.maximum(h_f32.astype(compute_dtype) + b, 0).astype(compute_dtype)
        # v5e: f32 VPU epilogue + single cast back to the matmul dtype.
        return jnp.maximum(h_f32 + b, 0.0).astype(compute_dtype)

    def kernel(x_ref, w1_ref, b1_ref, w2_ref, b2_ref, w3_ref, b3_ref, o_ref):
        # Hoist resident operands out of the sub-block loop (single VMEM read each).
        w1 = w1_ref[...]
        w2 = w2_ref[...]
        w3 = w3_ref[...]
        b1 = b1_ref[...]
        b2 = b2_ref[...]
        b3 = b3_ref[...]  # f32
        # Static unroll over independent row sub-blocks: the next sub-block's layer-1
        # MXU matmul can overlap the previous sub-block's bias/ReLU/sigmoid epilogue.
        for s in range(n_sub):
            r0 = s * sub_rows  # static offset
            xs = x_ref[pl.ds(r0, sub_rows), :].astype(compute_dtype)  # in-kernel cast
            h = jnp.dot(xs, w1, preferred_element_type=jnp.float32)
            h = bias_relu(h, b1)
            h = jnp.dot(h, w2, preferred_element_type=jnp.float32)
            h = bias_relu(h, b2)
            z = jnp.dot(h, w3, preferred_element_type=jnp.float32) + b3
            o_ref[pl.ds(r0, sub_rows), :] = jax.nn.sigmoid(z).astype(o_ref.dtype)

    return kernel


def prepare_params(params, compute_dtype=jnp.bfloat16, epilogue_dtype=None):
    """One-time glue (hoisted out of the per-call path): torch-convention (out, in)
    weights -> (in, out); hidden/output dims zero-padded to multiples of 128
    (lane-dense MXU tiles, unmasked output stores); weights cast to compute_dtype.
    w1's K dim is left unpadded so x streams in its original dtype/shape and is cast
    in-kernel. b1/b2 are stored in the epilogue dtype (bf16 on v6e/v7x, f32 on v5e);
    b3 stays f32 (added right before the sigmoid)."""
    if epilogue_dtype is None:
        epilogue_dtype = _epilogue_dtype_for_device()

    in_dim, hid_dim = params["w1"].shape[1], params["w1"].shape[0]
    out_dim = params["w3"].shape[0]
    hid_p = _round_up(hid_dim, 128)
    out_p = _round_up(out_dim, 128)

    def pad_w(w_t, rows, cols):  # w_t already (in, out)
        return jnp.pad(w_t, ((0, rows - w_t.shape[0]), (0, cols - w_t.shape[1])))

    def pad_b(b, cols, dtype):
        return jnp.pad(b, (0, cols - b.shape[0]))[None, :].astype(dtype)

    return {
        "w1": pad_w(params["w1"].T, in_dim, hid_p).astype(compute_dtype),
        "w2": pad_w(params["w2"].T, hid_p, hid_p).astype(compute_dtype),
        "w3": pad_w(params["w3"].T, hid_p, out_p).astype(compute_dtype),
        "b1": pad_b(params["b1"], hid_p, epilogue_dtype),
        "b2": pad_b(params["b2"], hid_p, epilogue_dtype),
        "b3": pad_b(params["b3"], out_p, jnp.float32),
        "dims": (in_dim, hid_dim, out_dim),
        "compute_dtype": compute_dtype,
        "epilogue_dtype": epilogue_dtype,
    }


def fcnn_forward(x, prepared, *, tile_b=512, out_dtype=None):
    """x: (B, input_dim). prepared: output of prepare_params."""
    w1, w2, w3 = prepared["w1"], prepared["w2"], prepared["w3"]
    b1, b2, b3 = prepared["b1"], prepared["b2"], prepared["b3"]
    in_dim, hid_dim, out_dim = prepared["dims"]
    cdt = prepared["compute_dtype"]
    edt = prepared["epilogue_dtype"]
    hid_p = w1.shape[1]
    out_p = w3.shape[1]
    out_dtype = x.dtype if out_dtype is None else out_dtype

    B = x.shape[0]
    vmem_cap = _vmem_capacity_bytes()
    weight_bytes = sum(int(a.size) * a.dtype.itemsize for a in (w1, w2, w3, b1, b2, b3))

    # Resident (weight/bias) specs, single-buffered when the API allows it.
    resident, buffered_ok = [], True
    for arr in (w1, b1, w2, b2, w3, b3):
        spec, ok = _resident_spec(arr.shape)
        resident.append(spec)
        buffered_ok = buffered_ok and ok
    weight_factor = 1 if buffered_ok else 2

    # Residency guard: if the (buffered) weights would eat most of per-core VMEM, fall
    # back to XLA rather than fail to compile or force tiny tiles.
    # TODO(synk): feature-tiled Pallas path (extra grid axis over hid_p/out_p blocks)
    # for very wide MLPs instead of the XLA fallback.
    if weight_factor * weight_bytes > int(0.6 * vmem_cap):
        h = jnp.maximum(
            jnp.dot(x.astype(cdt), w1, preferred_element_type=jnp.float32)
            + b1.astype(jnp.float32), 0.0).astype(cdt)
        h = jnp.maximum(
            jnp.dot(h, w2, preferred_element_type=jnp.float32)
            + b2.astype(jnp.float32), 0.0).astype(cdt)
        z = jnp.dot(h, w3, preferred_element_type=jnp.float32) + b3
        return jax.nn.sigmoid(z)[:, :out_dim].astype(out_dtype)

    # ---- batch tiling: balanced tiles, >=2 tiles when possible (v7x megacore) ----
    max_tile = max(16, _round_up(min(int(tile_b), max(B, 1)), 16))
    n_tiles = pl.cdiv(B, max_tile)
    if B >= 32:
        n_tiles = max(n_tiles, 2)            # keep v7x's second TensorCore busy
    tile_rows = _round_up(pl.cdiv(B, n_tiles), 16)   # 16: bf16 (16,128) sublane pack
    n_tiles = pl.cdiv(B, tile_rows)
    b_pad = n_tiles * tile_rows

    # Pad only batch rows when needed; no full pad+cast HBM pass over x.
    x_p = x if b_pad == B else jnp.pad(x, ((0, b_pad - B), (0, 0)))

    # In-kernel sub-blocking so MXU work overlaps the VPU/EUP epilogue.
    n_sub = 1
    for cand in (4, 2):
        if tile_rows % (16 * cand) == 0 and tile_rows // cand >= 64:
            n_sub = cand
            break
    sub_rows = tile_rows // n_sub

    kernel = _make_fcnn_kernel(n_sub, sub_rows, cdt, edt)

    # VMEM budget: resident weights (+factor) + double-buffered x/out streams +
    # per-sub-block f32 intermediates; clamp to ~82% of per-core capacity.
    in_dsz = jnp.dtype(x.dtype).itemsize
    out_dsz = jnp.dtype(out_dtype).itemsize
    stream_bytes = 2 * tile_rows * (in_dim * in_dsz + out_p * out_dsz)
    act_bytes = 2 * sub_rows * hid_p * 4
    needed = weight_factor * weight_bytes + stream_bytes + act_bytes
    vmem_limit = int(min(max(int(needed * 1.5), 32 << 20), int(vmem_cap * 0.82)))

    flops = 2 * b_pad * (in_dim * hid_p + hid_p * hid_p + hid_p * out_p)
    bytes_accessed = int(x_p.size * in_dsz + weight_bytes + b_pad * out_p * out_dsz)

    out_padded = pl.pallas_call(
        kernel,
        out_shape=jax.ShapeDtypeStruct((b_pad, out_p), out_dtype),
        grid=(n_tiles,),
        in_specs=[
            pl.BlockSpec((tile_rows, in_dim), lambda i: (i, 0)),   # x streams over batch
            resident[0], resident[1],   # w1, b1
            resident[2], resident[3],   # w2, b2
            resident[4], resident[5],   # w3, b3
        ],
        out_specs=pl.BlockSpec((tile_rows, out_p), lambda i: (i, 0)),
        compiler_params=pltpu.CompilerParams(
            dimension_semantics=("parallel",),   # shard batch tiles across TCs on v7x
            vmem_limit_bytes=vmem_limit,
        ),
        cost_estimate=pl.CostEstimate(
            flops=flops,
            transcendentals=b_pad * out_p,
            bytes_accessed=bytes_accessed,
        ),
    )(x_p, w1, b1, w2, b2, w3, b3)

    # Slice off batch / lane padding.
    return out_padded[:B, :out_dim]


def init_params(key, input_dim, hidden_dim, output_dim):
    """Deterministic init mimicking nn.Linear's uniform(-1/sqrt(fan_in), 1/sqrt(fan_in))."""
    keys = jax.random.split(key, 6)

    def linear(kw, kb, fan_in, fan_out):
        bound = 1.0 / (fan_in ** 0.5)
        w = jax.random.uniform(kw, (fan_out, fan_in), jnp.float32, -bound, bound)
        b = jax.random.uniform(kb, (fan_out,), jnp.float32, -bound, bound)
        return w, b

    w1, b1 = linear(keys[0], keys[1], input_dim, hidden_dim)
    w2, b2 = linear(keys[2], keys[3], hidden_dim, hidden_dim)
    w3, b3 = linear(keys[4], keys[5], hidden_dim, output_dim)
    return {"w1": w1, "b1": b1, "w2": w2, "b2": b2, "w3": w3, "b3": b3}


def fcnn_reference(x, p):
    h1 = jnp.maximum(x @ p["w1"].T + p["b1"], 0.0)
    h2 = jnp.maximum(h1 @ p["w2"].T + p["b2"], 0.0)
    z = h2 @ p["w3"].T + p["b3"]
    return jax.nn.sigmoid(z)


if __name__ == "__main__":
    batch, input_dim, hidden_dim, output_dim = 8, 16, 32, 8

    key = jax.random.PRNGKey(0)
    kx, kp = jax.random.split(key)
    x = jax.random.normal(kx, (batch, input_dim), jnp.float32)
    params = init_params(kp, input_dim, hidden_dim, output_dim)

    prepared = prepare_params(params)          # one-time transpose/pad/cast
    out = fcnn_forward(x, prepared)
    out = jax.block_until_ready(out)

    ref = fcnn_reference(x, params)            # f32 reference
    assert out.shape == (batch, output_dim)
    # bf16 matmul operands (+ bf16 epilogue on v6e/v7x) vs the f32 reference.
    assert jnp.allclose(out, ref, atol=3e-2, rtol=3e-2), "mismatch vs JAX reference"

    print("KERNEL_OK")
</pallas_src>

<mosaic_0001>
module attributes {stable_mosaic.version = 11 : i64} {
  func.func @kernel(%arg0: i32, %arg1: memref<16x16xf32, #tpu.memory_space<vmem>>, %arg2: memref<16x128xbf16, #tpu.memory_space<vmem>>, %arg3: memref<1x128xf32, #tpu.memory_space<vmem>>, %arg4: memref<128x128xbf16, #tpu.memory_space<vmem>>, %arg5: memref<1x128xf32, #tpu.memory_space<vmem>>, %arg6: memref<128x128xbf16, #tpu.memory_space<vmem>>, %arg7: memref<1x128xf32, #tpu.memory_space<vmem>>, %arg8: memref<16x128xf32, #tpu.memory_space<vmem>>) attributes {dimension_semantics = [#tpu.dimension_semantics<parallel>], iteration_bounds = array<i64: 1>, scalar_prefetch = 0 : i64, scratch_operands = 0 : i64, tpu.core_type = #tpu.core_type<tc>, window_params = [{transform_indices = @transform_0, window_bounds = array<i64: 16, 16>}, {pipeline_mode = #tpu.pipeline_mode<synchronous>, transform_indices = @transform_1, window_bounds = array<i64: 16, 128>}, {pipeline_mode = #tpu.pipeline_mode<synchronous>, transform_indices = @transform_2, window_bounds = array<i64: 1, 128>}, {pipeline_mode = #tpu.pipeline_mode<synchronous>, transform_indices = @transform_3, window_bounds = array<i64: 128, 128>}, {pipeline_mode = #tpu.pipeline_mode<synchronous>, transform_indices = @transform_4, window_bounds = array<i64: 1, 128>}, {pipeline_mode = #tpu.pipeline_mode<synchronous>, transform_indices = @transform_5, window_bounds = array<i64: 128, 128>}, {pipeline_mode = #tpu.pipeline_mode<synchronous>, transform_indices = @transform_6, window_bounds = array<i64: 1, 128>}, {transform_indices = @transform_7, window_bounds = array<i64: 16, 128>}]} {
    %c0 = arith.constant 0 : index
    %c0_0 = arith.constant 0 : index
    %0 = vector.load %arg2[%c0, %c0_0] : memref<16x128xbf16, #tpu.memory_space<vmem>>, vector<16x128xbf16>
    %c0_1 = arith.constant 0 : index
    %c0_2 = arith.constant 0 : index
    %1 = vector.load %arg4[%c0_1, %c0_2] : memref<128x128xbf16, #tpu.memory_space<vmem>>, vector<128x128xbf16>
    %c0_3 = arith.constant 0 : index
    %c0_4 = arith.constant 0 : index
    %2 = vector.load %arg6[%c0_3, %c0_4] : memref<128x128xbf16, #tpu.memory_space<vmem>>, vector<128x128xbf16>
    %c0_5 = arith.constant 0 : index
    %c0_6 = arith.constant 0 : index
    %3 = vector.load %arg3[%c0_5, %c0_6] : memref<1x128xf32, #tpu.memory_space<vmem>>, vector<1x128xf32>
    %c0_7 = arith.constant 0 : index
    %c0_8 = arith.constant 0 : index
    %4 = vector.load %arg5[%c0_7, %c0_8] : memref<1x128xf32, #tpu.memory_space<vmem>>, vector<1x128xf32>
    %c0_9 = arith.constant 0 : index
    %c0_10 = arith.constant 0 : index
    %5 = vector.load %arg7[%c0_9, %c0_10] : memref<1x128xf32, #tpu.memory_space<vmem>>, vector<1x128xf32>
    %c0_11 = arith.constant 0 : index
    %c0_12 = arith.constant 0 : index
    %6 = vector.load %arg1[%c0_11, %c0_12] : memref<16x16xf32, #tpu.memory_space<vmem>>, vector<16x16xf32>
    %7 = arith.truncf %6 : vector<16x16xf32> to vector<16x16xbf16>
    %cst = arith.constant dense<0.000000e+00> : vector<16x128xf32>
    %8 = tpu.matmul %7, %0, %cst {dimension_numbers = #tpu.dot_dimension_numbers<[1], [0], [0], [1], [0, 0, 1, 1], [], []>} : vector<16x16xbf16>, vector<16x128xbf16>, vector<16x128xf32> -> vector<16x128xf32>
    %9 = vector.broadcast %3 : vector<1x128xf32> to vector<16x128xf32>
    %10 = arith.addf %8, %9 : vector<16x128xf32>
    %cst_13 = arith.constant 0.000000e+00 : f32
    %11 = vector.broadcast %cst_13 : f32 to vector<16x128xf32>
    %12 = arith.maximumf %10, %11 : vector<16x128xf32>
    %13 = arith.truncf %12 : vector<16x128xf32> to vector<16x128xbf16>
    %cst_14 = arith.constant dense<0.000000e+00> : vector<16x128xf32>
    %14 = tpu.matmul %13, %1, %cst_14 {dimension_numbers = #tpu.dot_dimension_numbers<[1], [0], [0], [1], [0, 0, 1, 1], [], []>} : vector<16x128xbf16>, vector<128x128xbf16>, vector<16x128xf32> -> vector<16x128xf32>
    %15 = vector.broadcast %4 : vector<1x128xf32> to vector<16x128xf32>
    %16 = arith.addf %14, %15 : vector<16x128xf32>
    %cst_15 = arith.constant 0.000000e+00 : f32
    %17 = vector.broadcast %cst_15 : f32 to vector<16x128xf32>
    %18 = arith.maximumf %16, %17 : vector<16x128xf32>
    %19 = arith.truncf %18 : vector<16x128xf32> to vector<16x128xbf16>
    %cst_16 = arith.constant dense<0.000000e+00> : vector<16x128xf32>
    %20 = tpu.matmul %19, %2, %cst_16 {dimension_numbers = #tpu.dot_dimension_numbers<[1], [0], [0], [1], [0, 0, 1, 1], [], []>} : vector<16x128xbf16>, vector<128x128xbf16>, vector<16x128xf32> -> vector<16x128xf32>
    %21 = vector.broadcast %5 : vector<1x128xf32> to vector<16x128xf32>
    %22 = arith.addf %20, %21 : vector<16x128xf32>
    %23 = arith.negf %22 : vector<16x128xf32>
    %24 = math.exp %23 : vector<16x128xf32>
    %cst_17 = arith.constant 1.000000e+00 : f32
    %25 = vector.broadcast %cst_17 : f32 to vector<16x128xf32>
    %26 = arith.addf %25, %24 : vector<16x128xf32>
    %27 = arith.divf %25, %26 : vector<16x128xf32>
    %c0_18 = arith.constant 0 : index
    %c0_19 = arith.constant 0 : index
    %28 = vector.load %arg8[%c0_18, %c0_19] : memref<16x128xf32, #tpu.memory_space<vmem>>, vector<16x128xf32>
    tpu.vector_store %arg8[%c0_18, %c0_19], %27 {strides = array<i32>} : memref<16x128xf32, #tpu.memory_space<vmem>>, vector<16x128xf32>,
    return
  }
  func.func @transform_0(%arg0: i32) -> (i32, i32) {
    %c0_i32 = arith.constant 0 : i32
    %c0_i32_0 = arith.constant 0 : i32
    return %arg0, %c0_i32 : i32, i32
  }
  func.func @transform_1(%arg0: i32) -> (i32, i32) {
    %c0_i32 = arith.constant 0 : i32
    %c0_i32_0 = arith.constant 0 : i32
    %c0_i32_1 = arith.constant 0 : i32
    return %c0_i32, %c0_i32_0 : i32, i32
  }
  func.func @transform_2(%arg0: i32) -> (i32, i32) {
    %c0_i32 = arith.constant 0 : i32
    %c0_i32_0 = arith.constant 0 : i32
    %c0_i32_1 = arith.constant 0 : i32
    return %c0_i32, %c0_i32_0 : i32, i32
  }
  func.func @transform_3(%arg0: i32) -> (i32, i32) {
    %c0_i32 = arith.constant 0 : i32
    %c0_i32_0 = arith.constant 0 : i32
    %c0_i32_1 = arith.constant 0 : i32
    return %c0_i32, %c0_i32_0 : i32, i32
  }
  func.func @transform_4(%arg0: i32) -> (i32, i32) {
    %c0_i32 = arith.constant 0 : i32
    %c0_i32_0 = arith.constant 0 : i32
    %c0_i32_1 = arith.constant 0 : i32
    return %c0_i32, %c0_i32_0 : i32, i32
  }
  func.func @transform_5(%arg0: i32) -> (i32, i32) {
    %c0_i32 = arith.constant 0 : i32
    %c0_i32_0 = arith.constant 0 : i32
    %c0_i32_1 = arith.constant 0 : i32
    return %c0_i32, %c0_i32_0 : i32, i32
  }
  func.func @transform_6(%arg0: i32) -> (i32, i32) {
    %c0_i32 = arith.constant 0 : i32
    %c0_i32_0 = arith.constant 0 : i32
    %c0_i32_1 = arith.constant 0 : i32
    return %c0_i32, %c0_i32_0 : i32, i32
  }
  func.func @transform_7(%arg0: i32) -> (i32, i32) {
    %c0_i32 = arith.constant 0 : i32
    %c0_i32_0 = arith.constant 0 : i32
    return %arg0, %c0_i32 : i32, i32
  }
}

</mosaic_0001>

<bundles_post_ra>
// kernel: tpu_custom_call.1
= control target key start
LH: loop header
LB: loop body
LE: loop exit
PB: predicated region body
PF: predicated region fallthrough
CT: control target
= control target key end

     0   :  { %12 = vsyncpa [#allocation3], 0  ;;  %s817_s0 = inlined_call_operand.hbm [shape: f32[16,16], index: 0, kind: input, shape index: {}]   ;;  %s818_s1 = inlined_call_operand.hbm [shape: bf16[16,128], index: 1, kind: input, shape index: {}]   ;;  %s819_s2 = inlined_call_operand.vmem [shape: f32[1,128], index: 2, kind: input, shape index: {}]   ;;  %s820_s3 = inlined_call_operand.hbm [shape: bf16[128,128], index: 3, kind: input, shape index: {}]   ;;  %s821_s4 = inlined_call_operand.vmem [shape: f32[1,128], index: 4, kind: input, shape index: {}]   ;;  %s822_s5 = inlined_call_operand.hbm [shape: bf16[128,128], index: 5, kind: input, shape index: {}]   ;;  %s823_s6 = inlined_call_operand.vmem [shape: f32[1,128], index: 6, kind: input, shape index: {}]   ;;  %s824_s7 = inlined_call_operand.hbm [shape: f32[16,128], index: 7, kind: output, shape index: {}]  }
   0x1   :  { %13 = vsyncpa [#allocation6], 0 }
   0x2   :  { %14 = vsyncpa [#allocation9], 0 }
   0x3   :  { %15 = vsyncpa [#allocation4], 0  ;;  %s652_s24 = smov [#allocation5]   ;;  %s534_s28 = scalar_lea.hbm %s818_s1, 128 }
   0x4   :  { %s33_s25 = sshll.u32 %s652_s24, 4  ;;  %p535_p0 = scmp.ne.s32.totalorder %s818_s1, %s534_s28  ;;  %s34_s25 = int_to_ptr.vmem [resolvable:$true] %s33_s25 }
   0x5   :  { %p538_p1 = scmp.lt.u32.totalorder %s534_s28, %s818_s1 }
   0x7   :  { %p540_p2 = pnand %p538_p1, %p535_p0 }
   0x9   :  { %543 = shalt.err (!%p540_p2)
}
   0xa   :  { %s544_s10 = scalar_lea.vmem %s34_s25, 128  ;;  %p549_p4 = scmp.lt.s32.totalorder %s34_s25, %s34_s25 }
   0xb   :  { %p545_p3 = scmp.ne.s32.totalorder %s34_s25, %s544_s10  ;;  %p550_p5 = scmp.lt.s32.totalorder %s544_s10, %s544_s10 }
   0xd   :  { %p551_p6 = por %p550_p5, %p549_p4 }
   0xf   :  { %p552_p7 = pnand %p551_p6, %p545_p3 }
  0x11   :  { %555 = shalt.err (!%p552_p7)
}
  0x12   :  { %s653_s11 = smov 64   ;;  %s654_s12 = smov 4  }
  0x13   :  { %39 = dma.hbm_to_vmem [thread:$0]  %s818_s1, 128, %s34_s25, [#allocation6], %s653_s11, %s653_s11, %s654_s12  }
  0x14   :  { %s655_s15 = smov [#allocation2]   ;;  %s556_s19 = scalar_lea.hbm %s817_s0, 256 }
  0x15   :  { %s21_s16 = sshll.u32 %s655_s15, 4  ;;  %p557_p8 = scmp.ne.s32.totalorder %s817_s0, %s556_s19  ;;  %s22_s16 = int_to_ptr.vmem [resolvable:$true] %s21_s16 }
  0x16   :  { %p560_p9 = scmp.lt.u32.totalorder %s556_s19, %s817_s0 }
  0x18   :  { %p562_p10 = pnand %p560_p9, %p557_p8 }
  0x1a   :  { %565 = shalt.err (!%p562_p10)
}
  0x1b   :  { %s566_s24 = scalar_lea.vmem %s22_s16, 256  ;;  %p571_p12 = scmp.lt.s32.totalorder %s22_s16, %s22_s16 }
  0x1c   :  { %p567_p11 = scmp.ne.s32.totalorder %s22_s16, %s566_s24  ;;  %p572_p13 = scmp.lt.s32.totalorder %s566_s24, %s566_s24 }
  0x1e   :  { %p573_p0 = por %p572_p13, %p571_p12 }
  0x20   :  { %p574_p1 = pnand %p573_p0, %p567_p11 }
  0x22   :  { %577 = shalt.err (!%p574_p1)
}
  0x23   :  { %s656_s1 = smov 128   ;;  %s657_s25 = smov 8  }
  0x24   :  { %27 = dma.hbm_to_vmem [thread:$0]  %s817_s0, 256, %s22_s16, [#allocation3], %s656_s1, %s656_s1, %s657_s25  }
  0x25   :  { %s658_s28 = smov [#allocation7]   ;;  %s659_s30 = smov [#allocation8]  }
  0x26   :  { %s47_s29 = sshll.u32 %s658_s28, 4  ;;  %s61_s8 = sshll.u32 %s659_s30, 4  ;;  %s48_s29 = int_to_ptr.vmem [resolvable:$true] %s47_s29  ;;  %s733_s8 = int_to_ptr.vmem [resolvable:$true] %s61_s8 }
  0x27   :  { %s578_s13 = scalar_lea.hbm %s820_s3, 1024 }
  0x28   :  { %p579_p2 = scmp.ne.s32.totalorder %s820_s3, %s578_s13  ;;  %p582_p3 = scmp.lt.u32.totalorder %s578_s13, %s820_s3 }
  0x2a   :  { %p584_p4 = pnand %p582_p3, %p579_p2 }
  0x2c   :  { %587 = shalt.err (!%p584_p4)
}
  0x2d   :  { %s588_s0 = scalar_lea.vmem %s48_s29, 1024  ;;  %p593_p6 = scmp.lt.s32.totalorder %s48_s29, %s48_s29 }
  0x2e   :  { %p589_p5 = scmp.ne.s32.totalorder %s48_s29, %s588_s0  ;;  %p594_p7 = scmp.lt.s32.totalorder %s588_s0, %s588_s0 }
  0x30   :  { %p595_p8 = por %p594_p7, %p593_p6 }
  0x32   :  { %p596_p9 = pnand %p595_p8, %p589_p5 }
  0x34   :  { %599 = shalt.err (!%p596_p9)
}
  0x35   :  { %53 = dma.hbm_to_vmem [thread:$0]  %s820_s3, 1024, %s48_s29, [#allocation6], %s653_s11, %s653_s11, %s654_s12  }
  0x36   :  { %s600_s22 = scalar_lea.hbm %s822_s5, 1024 }
  0x37   :  { %p601_p10 = scmp.ne.s32.totalorder %s822_s5, %s600_s22  ;;  %p604_p11 = scmp.lt.u32.totalorder %s600_s22, %s822_s5 }
  0x39   :  { %p606_p12 = pnand %p604_p11, %p601_p10 }
  0x3b   :  { %609 = shalt.err (!%p606_p12)
}
  0x3c   :  { %s610_s28 = scalar_lea.vmem %s733_s8, 1024  ;;  %p615_p0 = scmp.lt.s32.totalorder %s733_s8, %s733_s8 }
  0x3d   :  { %p611_p13 = scmp.ne.s32.totalorder %s733_s8, %s610_s28  ;;  %p616_p1 = scmp.lt.s32.totalorder %s610_s28, %s610_s28 }
  0x3f   :  { %p617_p2 = por %p616_p1, %p615_p0 }
  0x41   :  { %p618_p3 = pnand %p617_p2, %p611_p13 }
  0x43   :  { %621 = shalt.err (!%p618_p3)
}
  0x44   :  { %67 = dma.hbm_to_vmem [thread:$0]  %s822_s5, 1024, %s733_s8, [#allocation9], %s653_s11, %s653_s11, %s654_s12  }
  0x45   :  { %644 = dma.done.wait [#allocation3], 256  }
  0x46   :  { %645 = vsyncadd [#allocation3], 4294967040 }
  0x47   :  { %646 = dma.done.wait [#allocation6], 1152  }
  0x48   :  { %647 = vsyncadd [#allocation6], 4294966144 }
  0x49   :  { %648 = dma.done.wait [#allocation9], 1024  }
  0x4a   :  { %649 = vsyncadd [#allocation9], 4294966272  ;;  %v660_v0 = vmov 0.0   ;;  %vm661_vm0 = vmmov 0   ;;  %v509_v1 = vld [vmem:[#allocation5] sm:$0xff]   ;;  %v120_v2 = vld [vmem:[#allocation2] sm:$0xff] }
  0x4b   :  { %452 = vmatprep.subr.bf16.mxu0 %v660_v0  ;;  %454 = vmatprep.mubr.msk.bf16.mxu0 %vm661_vm0, %v660_v0  ;;  %v121_v3 = vld [vmem:[#allocation2 + $0x8] sm:$0xff]  ;;  %vm135_vm1 = vcmask 130048   ;;  %v510_v5 = vld [vmem:[#allocation7] sm:$0xff]   ;;  %v511_v6 = vld [vmem:[#allocation7 + $0x8] sm:$0xff]  }
  0x4c   :  { %458 = vmatprep.subr.bf16.mxu1 %v660_v0  ;;  %474 = vmatprep.mubr.msk.bf16.mxu1 %vm661_vm0, %v660_v0  ;;  %v122_v4 = vpack.c.bf16 %v121_v3, %v120_v2  ;;  %v512_v7 = vld [vmem:[#allocation7 + $0x10] sm:$0xff]   ;;  %v513_v8 = vld [vmem:[#allocation7 + $0x18] sm:$0xff]   ;;  %v514_v9 = vld [vmem:[#allocation7 + $0x20] sm:$0xff]  }
  0x4d   :  { %453 = vmatpush3.bf16.msra.mxu0 %v509_v1  ;;  %459 = vmatpush3.bf16.msra.mxu1 %v510_v5  ;;  %v515_v10 = vld [vmem:[#allocation7 + $0x28] sm:$0xff]   ;;  %v516_v11 = vld [vmem:[#allocation7 + $0x30] sm:$0xff]   ;;  %v517_v12 = vld [vmem:[#allocation7 + $0x38] sm:$0xff]  }
  0x4e   :  { %478 = vmatprep.subr.bf16.mxu0 %v660_v0  ;;  %460 = vmatprep.subr.bf16.mxu1 %v660_v0  ;;  %v518_v13 = vld [vmem:[#allocation8] sm:$0xff]   ;;  %v519_v14 = vld [vmem:[#allocation8 + $0x8] sm:$0xff]   ;;  %v520_v15 = vld [vmem:[#allocation8 + $0x10] sm:$0xff]  }
  0x4f   :  { %v521_v16 = vld [vmem:[#allocation8 + $0x18] sm:$0xff]   ;;  %v522_v17 = vld [vmem:[#allocation8 + $0x20] sm:$0xff]   ;;  %v523_v18 = vld [vmem:[#allocation8 + $0x28] sm:$0xff]  }
  0x50   :  { %455 = vmatmul.mubr.msk.bf16.vlgmr.msra.gmra.mrb[0].mxu0 %vm135_vm1, %v122_v4  ;;  %v409_v19 = vld [vmem:[%s819_s2] ss:$0 sm:$0xff]  ;;  %v524_v29 = vld [vmem:[#allocation8 + $0x30] sm:$0xff]   ;;  %v525_v30 = vld [vmem:[#allocation8 + $0x38] sm:$0xff]  }
  0x51   :  { %494 = vmatprep.mubr.msk.bf16.mxu0 %vm661_vm0, %v660_v0  ;;  %461 = vmatpush3.bf16.msra.mxu1 %v511_v6  ;;  %v412_v31 = vld [vmem:[%s821_s4] ss:$0 sm:$0xff]  ;;  %s662_s4 = smov [#allocation10]  }
  0x52   :  { %462 = vmatprep.subr.bf16.mxu1 %v660_v0  ;;  %479 = vmatpush3.bf16.msra.mxu0 %v518_v13  ;;  %v421_v41 = vld [vmem:[%s823_s6] ss:$0 sm:$0xff]  ;;  %s395_s9 = sshll.u32 %s662_s4, 4  ;;  %s396_s9 = int_to_ptr.vmem [resolvable:$true] %s395_s9 }
  0x53   :  { %480 = vmatprep.subr.bf16.mxu0 %v660_v0  ;;  %s622_s6 = scalar_lea.vmem %s396_s9, 256  ;;  %p627_p5 = scmp.lt.s32.totalorder %s396_s9, %s396_s9 }
  0x54   :  { %p623_p4 = scmp.ne.s32.totalorder %s396_s9, %s622_s6  ;;  %p628_p6 = scmp.lt.s32.totalorder %s622_s6, %s622_s6 }
  0x55   :  { %463 = vmatpush3.bf16.msra.mxu1 %v512_v7 }
  0x56   :  { %464 = vmatprep.subr.bf16.mxu1 %v660_v0  ;;  %481 = vmatpush3.bf16.msra.mxu0 %v519_v14  ;;  %p629_p7 = por %p628_p6, %p627_p5 }
  0x57   :  { %482 = vmatprep.subr.bf16.mxu0 %v660_v0 }
  0x58   :  { %p630_p8 = pnand %p629_p7, %p623_p4 }
  0x59   :  { %465 = vmatpush3.bf16.msra.mxu1 %v513_v8 }
  0x5a   :  { %466 = vmatprep.subr.bf16.mxu1 %v660_v0  ;;  %483 = vmatpush3.bf16.msra.mxu0 %v520_v15 }
  0x5b   :  { %484 = vmatprep.subr.bf16.mxu0 %v660_v0 }
  0x5d   :  { %467 = vmatpush3.bf16.msra.mxu1 %v514_v9 }
  0x5e   :  { %468 = vmatprep.subr.bf16.mxu1 %v660_v0  ;;  %485 = vmatpush3.bf16.msra.mxu0 %v521_v16 }
  0x5f   :  { %486 = vmatprep.subr.bf16.mxu0 %v660_v0 }
  0x61   :  { %469 = vmatpush3.bf16.msra.mxu1 %v515_v10 }
  0x62   :  { %470 = vmatprep.subr.bf16.mxu1 %v660_v0  ;;  %487 = vmatpush3.bf16.msra.mxu0 %v522_v17 }
  0x63   :  { %488 = vmatprep.subr.bf16.mxu0 %v660_v0 }
  0x65   :  { %471 = vmatpush3.bf16.msra.mxu1 %v516_v11 }
  0x66   :  { %472 = vmatprep.subr.bf16.mxu1 %v660_v0  ;;  %489 = vmatpush3.bf16.msra.mxu0 %v523_v18 }
  0x67   :  { %490 = vmatprep.subr.bf16.mxu0 %v660_v0 }
  0x69   :  { %473 = vmatpush3.bf16.msra.mxu1 %v517_v12 }
  0x6a   :  { %491 = vmatpush3.bf16.msra.mxu0 %v524_v29 }
  0x6b   :  { %492 = vmatprep.subr.bf16.mxu0 %v660_v0 }
  0x6e   :  { %493 = vmatpush3.bf16.msra.mxu0 %v525_v30 }
 0x123   :  { %v173_v20 = vpop.f32.mrb[0].mxu0 }
 0x124   :  { %v174_v21 = vadd.f32 %v409_v19, %v173_v20  ;;  %v456_v22 = vpop.f32.mrb[1].mxu0 }
 0x125   :  { %v176_v23 = vpop.f32.mrb[2].mxu0 }
 0x126   :  { %v177_v24 = vadd.f32 %v409_v19, %v176_v23  ;;  %v457_v25 = vpop.f32.mrb[3].mxu0  ;;  %v180_v26 = vmax.f32 %v174_v21, 0.0 }
 0x128   :  { %v181_v27 = vmax.f32 %v177_v24, 0.0 }
 0x12a   :  { %v182_v28 = vpack.c.bf16 %v181_v27, %v180_v26 }
 0x12c   :  { %475 = vmatmul.mubr.bf16.vlgmr.msra.gmra.mrb[0].mxu1 %v182_v28 }
 0x1ff   :  { %v271_v32 = vpop.f32.mrb[0].mxu1 }
 0x200   :  { %v272_v33 = vadd.f32 %v412_v31, %v271_v32  ;;  %v476_v34 = vpop.f32.mrb[1].mxu1 }
 0x201   :  { %v274_v35 = vpop.f32.mrb[2].mxu1 }
 0x202   :  { %v275_v36 = vadd.f32 %v412_v31, %v274_v35  ;;  %v477_v37 = vpop.f32.mrb[3].mxu1  ;;  %v278_v38 = vmax.f32 %v272_v33, 0.0 }
 0x204   :  { %v279_v39 = vmax.f32 %v275_v36, 0.0 }
 0x206   :  { %v280_v40 = vpack.c.bf16 %v279_v39, %v278_v38 }
 0x208   :  { %495 = vmatmul.mubr.bf16.vlgmr.msra.gmra.mrb[4].mxu0 %v280_v40 }
 0x2db   :  { %v369_v42 = vpop.f32.mrb[4].mxu0 }
 0x2dc   :  { %v370_v43 = vadd.f32 %v421_v41, %v369_v42  ;;  %v496_v44 = vpop.f32.mrb[5].mxu0 }
 0x2dd   :  { %v372_v45 = vpop.f32.mrb[6].mxu0 }
 0x2de   :  { %v430_v46 = vmul.f32 -1.442695, %v370_v43  ;;  %v373_v47 = vadd.f32 %v421_v41, %v372_v45  ;;  %v497_v48 = vpop.f32.mrb[7].mxu0 }
 0x2e0   :  { %526 = vpow2.f32 %v430_v46  ;;  %v431_v49 = vmul.f32 -1.442695, %v373_v47 }
 0x2e2   :  { %528 = vpow2.f32 %v431_v49 }
 0x2ea   :  { %v527_v50 = vpop.eup %526 }
 0x2eb   :  { %v382_v51 = vadd.f32 1.0, %v527_v50 }
 0x2ec   :  { %v529_v52 = vpop.eup %528 }
 0x2ed   :  { %530 = vrcp.f32 %v382_v51  ;;  %v383_v53 = vadd.f32 1.0, %v529_v52 }
 0x2ef   :  { %532 = vrcp.f32 %v383_v53 }
 0x2f7   :  { %v531_v54 = vpop.eup %530 }
 0x2f8   :  { %388 = vst [vmem:[#allocation10] sm:$0xff] %v531_v54 }
 0x2f9   :  { %v533_v55 = vpop.eup %532 }
 0x2fa   :  { %389 = vst [vmem:[#allocation10 + $0x8] sm:$0xff] %v533_v55 }
 0x2fb   :  { %633 = shalt.err (!%p630_p8)
}
 0x2fc   :  { %s634_s14 = scalar_lea.hbm %s824_s7, 256 }
 0x2fd   :  { %p635_p9 = scmp.ne.s32.totalorder %s824_s7, %s634_s14  ;;  %p638_p10 = scmp.lt.u32.totalorder %s634_s14, %s824_s7 }
 0x2ff   :  { %p640_p11 = pnand %p638_p10, %p635_p9 }
 0x301   :  { %643 = shalt.err (!%p640_p11)
}
 0x302   :  { %401 = dma.vmem_to_hbm [thread:$0]  %s396_s9, 256, %s824_s7, [#allocation4], %s656_s1, %s656_s1, %s657_s25  }
 0x303   :  { %650 = dma.done.wait [#allocation4], 256  }
 0x304   :  { %651 = vsyncadd [#allocation4], 4294967040 }
 0x305   :  { %405 = vsyncpa [#allocation3], 1 }
 0x306   :  { %406 = vsyncpa [#allocation6], 1 }
 0x307   :  { %407 = vsyncpa [#allocation9], 1 }
 0x308   :  { %408 = vsyncpa [#allocation4], 1 }

</bundles_post_ra>
